<compile_context>
chip_gen: v7x
topology: tpu7x:2x2x1
jax: 0.10.0
libtpu: 0.0.40
codegen_flags: <defaults>
</compile_context>

<pallas_src>
import functools

import jax
import jax.numpy as jnp
from jax.experimental import pallas as pl
from jax.experimental.pallas import tpu as pltpu


DEFAULT_TILE_B = 4096   # columns (batch rows) per grid step


def ffnn_kernel(x_ref, w1_ref, b1_ref, w2_ref, b2_ref, o_ref):
    # fc1 on the MXU, batch on lanes: (H, d_in) @ (d_in, tile_b) -> (H, tile_b).
    h = jnp.dot(w1_ref[...], x_ref[...], preferred_element_type=jnp.float32)
    # Bias (lane-broadcast of an (H, 1) column) + tanh, fully lane-dense.
    # TODO(synk): if profiling shows the EUP (tanh) binding on v6e/v7x, cast h
    # to bfloat16 just for the tanh (keep f32 matmul accumulation).
    h = jnp.tanh(h + b1_ref[...])
    # fc2: (1, H) @ (H, tile_b) -> (1, tile_b); batch stays on lanes so the
    # store below is a lane-dense unmasked vst.
    out = jnp.dot(w2_ref[...], h, preferred_element_type=jnp.float32)
    o_ref[...] = out + b2_ref[0]          # scalar bias read from SMEM


def _round_up(x, m):
    return (x + m - 1) // m * m


@functools.partial(jax.jit, static_argnames=("tile_b", "column_output"))
def feed_forward_nn(x_fm, w1, b1, w2, b2, *, tile_b=DEFAULT_TILE_B,
                    column_output=True):
    """out = fc2(tanh(fc1(x))) computed by one Pallas TPU kernel.

    x_fm: (d_in, B) float32  -- feature-major (batch on the minor axis).
          Producers should stage x in this layout directly; transposing a
          (B, d_in) array right before the call re-reads its lane-padded HBM
          layout and forfeits most of the bandwidth win.
    w1:   (H, d_in)  -- fc1.weight in PyTorch nn.Linear layout.
    b1:   (H,)       -- fc1.bias.
    w2:   (1, H)     -- fc2.weight in PyTorch nn.Linear layout.
    b2:   (1,) / ()  -- fc2.bias.
    Returns (B, 1) float32 if column_output else (B,) float32.
    """
    d_in, B = x_fm.shape
    H = w1.shape[0]

    # Tile selection: big enough to amortize per-step overhead, clamped so a
    # tiny batch doesn't compute thousands of pad rows, and capped at ~half the
    # (128-rounded) batch so the "parallel" axis has >= 2 steps when possible.
    b128 = _round_up(B, 128)
    tile = max(128, min(tile_b, _round_up(pl.cdiv(b128, 2), 128), b128))
    num_tiles = pl.cdiv(B, tile)
    b_pad = num_tiles * tile

    x_fm = x_fm.astype(jnp.float32)
    if b_pad != B:
        # Ragged tail: zero-pad the batch (lanes); pad entries are sliced off below.
        x_fm = jnp.pad(x_fm, ((0, 0), (0, b_pad - B)))

    w1_f = w1.astype(jnp.float32)                       # (H, d_in), resident
    b1_col = b1.reshape(H, 1).astype(jnp.float32)       # (H, 1) column, resident
    w2_row = w2.reshape(1, H).astype(jnp.float32)       # (1, H) row, resident
    b2_s = jnp.asarray(b2, jnp.float32).reshape(1)      # true scalar -> SMEM

    out_row = pl.pallas_call(
        ffnn_kernel,
        out_shape=jax.ShapeDtypeStruct((1, b_pad), jnp.float32),
        grid=(num_tiles,),
        in_specs=[
            # x streams through (only large input); everything else is
            # VMEM-resident and fetched once (index_map -> (0, 0)).
            # TODO(synk): add pipeline_mode=pl.Buffered(3) here if an xprof
            # trace still shows exposed input DMA after these layout changes.
            pl.BlockSpec((d_in, tile), lambda i: (0, i)),
            pl.BlockSpec((H, d_in), lambda i: (0, 0)),
            pl.BlockSpec((H, 1), lambda i: (0, 0)),
            pl.BlockSpec((1, H), lambda i: (0, 0)),
            pl.BlockSpec(memory_space=pltpu.MemorySpace.SMEM),
        ],
        out_specs=pl.BlockSpec((1, tile), lambda i: (0, i)),   # lane-dense row
        compiler_params=pltpu.CompilerParams(
            dimension_semantics=("parallel",),   # v7x: shard batch over both TCs
        ),
    )(x_fm, w1_f, b1_col, w2_row, b2_s)

    row = out_row[0, :B]          # (B,) lane-dense; no 128x-padded HBM column
    if not column_output:
        return row
    # (B, 1) required by the nn.Module contract; this layout is inherently
    # lane-padded in HBM, so it is materialized exactly once and only over the
    # B valid entries (not the tile-padded batch).
    return row.reshape(B, 1)


if __name__ == "__main__":
    key = jax.random.PRNGKey(0)
    input_dim = 8       # number of lag features in the original script
    hidden_dim = 32

    kx, kw1, kb1, kw2, kb2, kx2 = jax.random.split(key, 6)

    # Parameters in PyTorch nn.Linear layout (weight: (out, in), bias: (out,)).
    bound1 = 1.0 / (input_dim ** 0.5)
    w1 = jax.random.uniform(kw1, (hidden_dim, input_dim), jnp.float32, -bound1, bound1)
    b1 = jax.random.uniform(kb1, (hidden_dim,), jnp.float32, -bound1, bound1)
    bound2 = 1.0 / (hidden_dim ** 0.5)
    w2 = jax.random.uniform(kw2, (1, hidden_dim), jnp.float32, -bound2, bound2)
    b2 = jax.random.uniform(kb2, (1,), jnp.float32, -bound2, bound2)

    def reference(x_fm):
        # Pure-JAX reference of the PyTorch forward (batch-major math).
        x = x_fm.T
        return jnp.tanh(x @ w1.T + b1) @ w2.T + b2

    # Case 1: tiny batch (the original demo scale) -- single 128-wide grid step.
    batch = 8
    x_fm = jax.random.normal(kx, (input_dim, batch), dtype=jnp.float32)
    out = jax.block_until_ready(feed_forward_nn(x_fm, w1, b1, w2, b2))
    assert out.shape == (batch, 1)
    assert jnp.allclose(out, reference(x_fm), atol=1e-5, rtol=1e-5), "case 1 mismatch"

    # Case 2: multi-step grid with a ragged (non multiple-of-tile) batch,
    # exercising the lane-blocked output indexing across several grid steps.
    batch2 = 300
    x_fm2 = jax.random.normal(kx2, (input_dim, batch2), dtype=jnp.float32)
    out2 = jax.block_until_ready(feed_forward_nn(x_fm2, w1, b1, w2, b2, tile_b=128))
    assert out2.shape == (batch2, 1)
    assert jnp.allclose(out2, reference(x_fm2), atol=1e-5, rtol=1e-5), "case 2 mismatch"

    print("KERNEL_OK")
</pallas_src>

<mosaic_0001>
module attributes {stable_mosaic.version = 11 : i64} {
  func.func @ffnn_kernel(%arg0: i32, %arg1: memref<8x128xf32, #tpu.memory_space<vmem>>, %arg2: memref<32x8xf32, #tpu.memory_space<vmem>>, %arg3: memref<32x1xf32, #tpu.memory_space<vmem>>, %arg4: memref<1x32xf32, #tpu.memory_space<vmem>>, %arg5: memref<1xf32, #tpu.memory_space<smem>>, %arg6: memref<1x128xf32, #tpu.memory_space<vmem>>) attributes {dimension_semantics = [#tpu.dimension_semantics<parallel>], iteration_bounds = array<i64: 1>, scalar_prefetch = 0 : i64, scratch_operands = 0 : i64, tpu.core_type = #tpu.core_type<tc>, window_params = [{transform_indices = @transform_0, window_bounds = array<i64: 8, 128>}, {pipeline_mode = #tpu.pipeline_mode<synchronous>, transform_indices = @transform_1, window_bounds = array<i64: 32, 8>}, {pipeline_mode = #tpu.pipeline_mode<synchronous>, transform_indices = @transform_2, window_bounds = array<i64: 32, 1>}, {pipeline_mode = #tpu.pipeline_mode<synchronous>, transform_indices = @transform_3, window_bounds = array<i64: 1, 32>}, {transform_indices = @transform_4, window_bounds = array<i64: 1>}, {transform_indices = @transform_5, window_bounds = array<i64: 1, 128>}]} {
    %c0 = arith.constant 0 : index
    %c0_0 = arith.constant 0 : index
    %0 = vector.load %arg2[%c0, %c0_0] : memref<32x8xf32, #tpu.memory_space<vmem>>, vector<32x8xf32>
    %c0_1 = arith.constant 0 : index
    %c0_2 = arith.constant 0 : index
    %1 = vector.load %arg1[%c0_1, %c0_2] : memref<8x128xf32, #tpu.memory_space<vmem>>, vector<8x128xf32>
    %cst = arith.constant dense<0.000000e+00> : vector<32x128xf32>
    %2 = tpu.matmul %0, %1, %cst {dimension_numbers = #tpu.dot_dimension_numbers<[1], [0], [0], [1], [0, 0, 1, 1], [], []>} : vector<32x8xf32>, vector<8x128xf32>, vector<32x128xf32> -> vector<32x128xf32>
    %c0_3 = arith.constant 0 : index
    %c0_4 = arith.constant 0 : index
    %3 = vector.load %arg3[%c0_3, %c0_4] : memref<32x1xf32, #tpu.memory_space<vmem>>, vector<32x1xf32>
    %4 = vector.broadcast %3 : vector<32x1xf32> to vector<32x128xf32>
    %5 = arith.addf %2, %4 : vector<32x128xf32>
    %6 = math.tanh %5 : vector<32x128xf32>
    %c0_5 = arith.constant 0 : index
    %c0_6 = arith.constant 0 : index
    %7 = vector.load %arg4[%c0_5, %c0_6] : memref<1x32xf32, #tpu.memory_space<vmem>>, vector<1x32xf32>
    %cst_7 = arith.constant dense<0.000000e+00> : vector<1x128xf32>
    %8 = tpu.matmul %7, %6, %cst_7 {dimension_numbers = #tpu.dot_dimension_numbers<[1], [0], [0], [1], [0, 0, 1, 1], [], []>} : vector<1x32xf32>, vector<32x128xf32>, vector<1x128xf32> -> vector<1x128xf32>
    %c0_8 = arith.constant 0 : index
    %9 = memref.load %arg5[%c0_8] : memref<1xf32, #tpu.memory_space<smem>>
    %10 = vector.broadcast %9 : f32 to vector<1x128xf32>
    %11 = arith.addf %8, %10 : vector<1x128xf32>
    %c0_9 = arith.constant 0 : index
    %c0_10 = arith.constant 0 : index
    %12 = vector.load %arg6[%c0_9, %c0_10] : memref<1x128xf32, #tpu.memory_space<vmem>>, vector<1x128xf32>
    tpu.vector_store %arg6[%c0_9, %c0_10], %11 {strides = array<i32>} : memref<1x128xf32, #tpu.memory_space<vmem>>, vector<1x128xf32>,
    return
  }
  func.func @transform_0(%arg0: i32) -> (i32, i32) {
    %c0_i32 = arith.constant 0 : i32
    %c0_i32_0 = arith.constant 0 : i32
    return %c0_i32, %arg0 : i32, i32
  }
  func.func @transform_1(%arg0: i32) -> (i32, i32) {
    %c0_i32 = arith.constant 0 : i32
    %c0_i32_0 = arith.constant 0 : i32
    %c0_i32_1 = arith.constant 0 : i32
    return %c0_i32, %c0_i32_0 : i32, i32
  }
  func.func @transform_2(%arg0: i32) -> (i32, i32) {
    %c0_i32 = arith.constant 0 : i32
    %c0_i32_0 = arith.constant 0 : i32
    %c0_i32_1 = arith.constant 0 : i32
    return %c0_i32, %c0_i32_0 : i32, i32
  }
  func.func @transform_3(%arg0: i32) -> (i32, i32) {
    %c0_i32 = arith.constant 0 : i32
    %c0_i32_0 = arith.constant 0 : i32
    %c0_i32_1 = arith.constant 0 : i32
    return %c0_i32, %c0_i32_0 : i32, i32
  }
  func.func @transform_4(%arg0: i32) -> i32 {
    %c0_i32 = arith.constant 0 : i32
    %c0_i32_0 = arith.constant 0 : i32
    return %c0_i32 : i32
  }
  func.func @transform_5(%arg0: i32) -> (i32, i32) {
    %c0_i32 = arith.constant 0 : i32
    %c0_i32_0 = arith.constant 0 : i32
    return %c0_i32, %arg0 : i32, i32
  }
}

</mosaic_0001>

<bundles_post_ra>
// kernel: feed_forward_nn.1
= control target key start
LH: loop header
LB: loop body
LE: loop exit
PB: predicated region body
PF: predicated region fallthrough
CT: control target
= control target key end

     0   :  { %vm50_vm0 = vcmask 64512   ;;  %v288_v3 = vmov 0   ;;  %v289_v10 = vmov 0.0|0.0   ;;  %vm290_vm1 = vmmov 0   ;;  %s362_s0 = inlined_call_operand.vmem [shape: f32[8,128], index: 0, kind: input, shape index: {}]   ;;  %s363_s1 = inlined_call_operand.vmem [shape: f32[32,8], index: 1, kind: input, shape index: {}]   ;;  %s364_s2 = inlined_call_operand.vmem [shape: f32[32,1], index: 2, kind: input, shape index: {}]   ;;  %s365_s3 = inlined_call_operand.vmem [shape: f32[1,32], index: 3, kind: input, shape index: {}]   ;;  %s366_s4 = inlined_call_operand.<no memory space> [shape: f32[1], index: 4, kind: input, shape index: {}]   ;;  %s367_s5 = inlined_call_operand.vmem [shape: f32[1,128], index: 5, kind: output, shape index: {}]  }
   0x1   :  { %v25_v0 = vld [vmem:[%s362_s0] sm:$0xff]  ;;  %v22_v2 = vld [vmem:[%s363_s1 + $0x8] sm:$0xff]  ;;  %278 = vset.pattern.permute.xlu0 %v288_v3  ;;  %279 = vset.pattern.permute.xlu1 %v288_v3  ;;  %v23_v4 = vld [vmem:[%s363_s1 + $0x10] sm:$0xff]  ;;  %v291_v11 = vmov 0.0   ;;  %vm155_vm2 = vcmask 261120   ;;  %v154_v31 = vstv %s366_s4 }
   0x2   :  { %v21_v1 = vld [vmem:[%s363_s1] sm:$0xff]  ;;  %249 = vmatprep.subr.mxu0 %v25_v0  ;;  %v28_v6 = vld [vmem:[%s364_s2 + $0x10] sm:$0xff]  ;;  %v27_v7 = vld [vmem:[%s364_s2 + $0x8] sm:$0xff]  ;;  %268 = vmatprep.subr.bf16.mxu1 %v289_v10 }
   0x3   :  { %251 = vmatprep.mubr.msk.f32.mxu0 %vm50_vm0, %v21_v1  ;;  %v26_v5 = vld [vmem:[%s364_s2] sm:$0xff]  ;;  %250 = vmatpush3.msra.mxu0 %v25_v0  ;;  %v24_v8 = vld [vmem:[%s363_s1 + $0x18] sm:$0xff] }
   0x4   :  { %32 = vperm.xlu0 %278, %v26_v5   ;;  %252 = vmatmul.mubr.msk.f32.vlgmr.msra.gmra.mrb[0].mxu0 %vm50_vm0, %v22_v2  ;;  %v29_v9 = vld [vmem:[%s364_s2 + $0x18] sm:$0xff]  ;;  %v152_v30 = vld [vmem:[%s365_s3] sm:$0x1] }
   0x5   :  { %42 = vperm.xlu1 %279, %v28_v6   ;;  %254 = vmatprep.mubr.msk.f32.mxu0 %vm50_vm0, %v23_v4 }
   0x6   :  { %265 = vmatprep.mubr.msk.f32.mxu1 %vm290_vm1, %v291_v11 }
   0x8   :  { %37 = vperm.xlu0 %278, %v27_v7   ;;  %255 = vmatmul.mubr.msk.f32.gmra.mrb[2].mxu0 %vm50_vm0, %v24_v8 }
   0x9   :  { %47 = vperm.xlu1 %279, %v29_v9  }
  0x83   :  { %v33_v12 = vpop.permute.xlu0 %32 }
  0x84   :  { %v43_v13 = vpop.permute.xlu1 %42 }
  0x87   :  { %v38_v14 = vpop.permute.xlu0 %37 }
  0x88   :  { %v48_v19 = vpop.permute.xlu1 %47 }
  0xd7   :  { %v253_v15 = vpop.f32.mrb[0].mxu0 }
  0xd8   :  { %v135_v16 = vadd.f32 %v253_v15, %v38_v14  ;;  %v129_v17 = vpop.f32.mrb[1].mxu0 }
  0xd9   :  { %v130_v18 = vadd.f32 %v129_v17, %v33_v12 }
  0xda   :  { %280 = vtanh.f32 %v135_v16 }
  0xdb   :  { %282 = vtanh.f32 %v130_v18  ;;  %v256_v20 = vpop.f32.mrb[2].mxu0 }
  0xdc   :  { %v145_v21 = vadd.f32 %v256_v20, %v48_v19  ;;  %v139_v22 = vpop.f32.mrb[3].mxu0 }
  0xdd   :  { %v140_v23 = vadd.f32 %v139_v22, %v43_v13 }
  0xde   :  { %284 = vtanh.f32 %v145_v21 }
  0xdf   :  { %286 = vtanh.f32 %v140_v23 }
  0xe4   :  { %v281_v24 = vpop.eup %280 }
  0xe5   :  { %v283_v25 = vpop.eup %282 }
  0xe6   :  { %v269_v26 = vpack.c.bf16 %v281_v24, %v283_v25 }
  0xe8   :  { %v285_v27 = vpop.eup %284  ;;  %270 = vmatpush3.bf16.msra.mxu1 %v269_v26 }
  0xe9   :  { %v287_v28 = vpop.eup %286  ;;  %271 = vmatprep.subr.bf16.mxu1 %v289_v10 }
  0xea   :  { %v272_v29 = vpack.c.bf16 %v285_v27, %v287_v28 }
  0xec   :  { %273 = vmatpush3.bf16.msra.mxu1 %v272_v29 }
  0xef   :  { %266 = vmatmul.mubr.msk.f32.vlgmr.msra.gmra.mrb[0].mxu1 %vm155_vm2, %v152_v30 }
 0x1c2   :  { %v225_v32 = vpop.f32.mrb[0].mxu1 }
 0x1c3   :  { %v226_v33 = vadd.f32 %v225_v32, %v154_v31  ;;  %v267_v34 = vpop.f32.mrb[1].mxu1 }
 0x1c5   :  { %229 = vst [vmem:[%s367_s5] sm:$0x1] %v226_v33 }

</bundles_post_ra>
